<compile_context>
chip_gen: v6e
topology: v6e:2x2x1
jax: 0.10.0
libtpu: 0.0.40
codegen_flags: <defaults>
</compile_context>

<pallas_src>
import jax
import jax.numpy as jnp
from jax.experimental import pallas as pl
from jax.experimental.pallas import tpu as pltpu


def _generator_kernel(x_ref,
                      w1_ref, b1_ref,
                      w2_ref, b2_ref,
                      w3_ref, b3_ref,
                      w4_ref, b4_ref,
                      out_ref):
    # x_ref: (input_size, TB)   weights: (out, in)   biases: (out, 1)
    x = x_ref[...].astype(jnp.float32)  # mirrors x.float() in the PyTorch forward

    # layer 1: Linear(input_size -> 8) + ReLU
    h = jnp.dot(w1_ref[...], x, preferred_element_type=jnp.float32) + b1_ref[...]
    h = jnp.maximum(h, 0.0)                                            # (8, TB)

    # layer 2: Linear(8 -> 16) + ReLU
    h = jnp.dot(w2_ref[...], h, preferred_element_type=jnp.float32) + b2_ref[...]
    h = jnp.maximum(h, 0.0)                                            # (16, TB)

    # layer 3: Linear(16 -> 8) + ReLU
    h = jnp.dot(w3_ref[...], h, preferred_element_type=jnp.float32) + b3_ref[...]
    h = jnp.maximum(h, 0.0)                                            # (8, TB)

    # layer 4: Linear(8 -> num_classes), no activation
    out_ref[...] = (jnp.dot(w4_ref[...], h, preferred_element_type=jnp.float32)
                    + b4_ref[...])                                     # (nc, TB)


def generator_forward(x, params, *, tb_max=4096):
    """Run the Generator forward pass as a batch-tiled Pallas kernel.

    x:      (B, input_size) array (any float dtype; cast to float32 inside).
    params: dict with w1..w4 of shape (out, in) and b1..b4 of shape (out, 1)
            (PyTorch-native nn.Linear layout).
    Returns (B, num_classes) float32, equivalent to the PyTorch module output.
    """
    B, input_size = x.shape
    num_classes = params["w4"].shape[0]

    # Lane-aligned batch tile (multiple of 128); pad B so the grid divides it.
    lane = 128
    b_lanes = pl.cdiv(B, lane) * lane
    tb = min(int(tb_max), int(b_lanes))
    b_pad = pl.cdiv(B, tb) * tb
    grid = (b_pad // tb,)

    # One transpose + zero-pad outside the kernel -> batch-in-lanes layout.
    x_t = jnp.pad(x.astype(jnp.float32).T, ((0, 0), (0, b_pad - B)))

    weight_ops = (
        params["w1"], params["b1"],
        params["w2"], params["b2"],
        params["w3"], params["b3"],
        params["w4"], params["b4"],
    )

    def _const_spec(shape):
        # Constant block index: operand stays VMEM-resident across grid steps.
        return pl.BlockSpec(shape, lambda i: (0, 0))

    in_specs = [pl.BlockSpec((input_size, tb), lambda i: (0, i))]
    in_specs += [_const_spec(op.shape) for op in weight_ops]
    out_spec = pl.BlockSpec((num_classes, tb), lambda i: (0, i))

    y_t = pl.pallas_call(
        _generator_kernel,
        out_shape=jax.ShapeDtypeStruct((num_classes, b_pad), jnp.float32),
        grid=grid,
        in_specs=in_specs,
        out_specs=out_spec,
        compiler_params=pltpu.CompilerParams(
            dimension_semantics=("parallel",)),
    )(x_t, *weight_ops)

    # Back to PyTorch's (B, num_classes) layout, dropping batch padding.
    # y_ = y_.view(x.size(0), 2)
    return y_t.T[:B].reshape(B, num_classes)


def init_generator_params(key, input_size=10, num_classes=2):
    """Deterministic params in PyTorch layout: W (out, in), b (out, 1)."""
    dims = [(input_size, 8), (8, 16), (16, 8), (8, num_classes)]
    params = {}
    for i, (fan_in, fan_out) in enumerate(dims, start=1):
        key, kw, kb = jax.random.split(key, 3)
        bound = float(fan_in) ** -0.5  # PyTorch default U(-1/sqrt(fan_in), +)
        params[f"w{i}"] = jax.random.uniform(
            kw, (fan_out, fan_in), jnp.float32, minval=-bound, maxval=bound)
        params[f"b{i}"] = jax.random.uniform(
            kb, (fan_out, 1), jnp.float32, minval=-bound, maxval=bound)
    return params


if __name__ == "__main__":
    key = jax.random.PRNGKey(0)
    k_params, k_x, k_x2 = jax.random.split(key, 3)

    input_size, num_classes, batch = 10, 2, 8
    params = init_generator_params(k_params, input_size, num_classes)

    hi = jax.lax.Precision.HIGHEST

    def ref(x, p):
        h = jnp.maximum(jnp.dot(x, p["w1"].T, precision=hi) + p["b1"].T, 0.0)
        h = jnp.maximum(jnp.dot(h, p["w2"].T, precision=hi) + p["b2"].T, 0.0)
        h = jnp.maximum(jnp.dot(h, p["w3"].T, precision=hi) + p["b3"].T, 0.0)
        return jnp.dot(h, p["w4"].T, precision=hi) + p["b4"].T

    # Tiny batch (matches the original demo).
    x = jax.random.normal(k_x, (batch, input_size), dtype=jnp.float32)
    y = jax.block_until_ready(generator_forward(x, params))
    assert y.shape == (batch, num_classes)
    assert jnp.allclose(y, ref(x, params), atol=1e-5, rtol=1e-5)

    # Ragged batch exercising grid > 1 and the padding path (small tile on purpose).
    x2 = jax.random.normal(k_x2, (300, input_size), dtype=jnp.float32)
    y2 = jax.block_until_ready(generator_forward(x2, params, tb_max=128))
    assert y2.shape == (300, num_classes)
    assert jnp.allclose(y2, ref(x2, params), atol=1e-5, rtol=1e-5)

    print("KERNEL_OK")
</pallas_src>

<mosaic_0001>
module attributes {stable_mosaic.version = 11 : i64} {
  func.func @_generator_kernel(%arg0: i32, %arg1: memref<10x128xf32, #tpu.memory_space<vmem>>, %arg2: memref<8x10xf32, #tpu.memory_space<vmem>>, %arg3: memref<8x1xf32, #tpu.memory_space<vmem>>, %arg4: memref<16x8xf32, #tpu.memory_space<vmem>>, %arg5: memref<16x1xf32, #tpu.memory_space<vmem>>, %arg6: memref<8x16xf32, #tpu.memory_space<vmem>>, %arg7: memref<8x1xf32, #tpu.memory_space<vmem>>, %arg8: memref<2x8xf32, #tpu.memory_space<vmem>>, %arg9: memref<2x1xf32, #tpu.memory_space<vmem>>, %arg10: memref<2x128xf32, #tpu.memory_space<vmem>>) attributes {dimension_semantics = [#tpu.dimension_semantics<parallel>], iteration_bounds = array<i64: 1>, scalar_prefetch = 0 : i64, scratch_operands = 0 : i64, tpu.core_type = #tpu.core_type<tc>, window_params = [{transform_indices = @transform_0, window_bounds = array<i64: 10, 128>}, {pipeline_mode = #tpu.pipeline_mode<synchronous>, transform_indices = @transform_1, window_bounds = array<i64: 8, 10>}, {pipeline_mode = #tpu.pipeline_mode<synchronous>, transform_indices = @transform_2, window_bounds = array<i64: 8, 1>}, {pipeline_mode = #tpu.pipeline_mode<synchronous>, transform_indices = @transform_3, window_bounds = array<i64: 16, 8>}, {pipeline_mode = #tpu.pipeline_mode<synchronous>, transform_indices = @transform_4, window_bounds = array<i64: 16, 1>}, {pipeline_mode = #tpu.pipeline_mode<synchronous>, transform_indices = @transform_5, window_bounds = array<i64: 8, 16>}, {pipeline_mode = #tpu.pipeline_mode<synchronous>, transform_indices = @transform_6, window_bounds = array<i64: 8, 1>}, {pipeline_mode = #tpu.pipeline_mode<synchronous>, transform_indices = @transform_7, window_bounds = array<i64: 2, 8>}, {pipeline_mode = #tpu.pipeline_mode<synchronous>, transform_indices = @transform_8, window_bounds = array<i64: 2, 1>}, {transform_indices = @transform_9, window_bounds = array<i64: 2, 128>}]} {
    %c0 = arith.constant 0 : index
    %c0_0 = arith.constant 0 : index
    %0 = vector.load %arg1[%c0, %c0_0] : memref<10x128xf32, #tpu.memory_space<vmem>>, vector<10x128xf32>
    %c0_1 = arith.constant 0 : index
    %c0_2 = arith.constant 0 : index
    %1 = vector.load %arg2[%c0_1, %c0_2] : memref<8x10xf32, #tpu.memory_space<vmem>>, vector<8x10xf32>
    %cst = arith.constant dense<0.000000e+00> : vector<8x128xf32>
    %2 = tpu.matmul %1, %0, %cst {dimension_numbers = #tpu.dot_dimension_numbers<[1], [0], [0], [1], [0, 0, 1, 1], [], []>} : vector<8x10xf32>, vector<10x128xf32>, vector<8x128xf32> -> vector<8x128xf32>
    %c0_3 = arith.constant 0 : index
    %c0_4 = arith.constant 0 : index
    %3 = vector.load %arg3[%c0_3, %c0_4] : memref<8x1xf32, #tpu.memory_space<vmem>>, vector<8x1xf32>
    %4 = vector.broadcast %3 : vector<8x1xf32> to vector<8x128xf32>
    %5 = arith.addf %2, %4 : vector<8x128xf32>
    %cst_5 = arith.constant 0.000000e+00 : f32
    %6 = vector.broadcast %cst_5 : f32 to vector<8x128xf32>
    %7 = arith.maximumf %5, %6 : vector<8x128xf32>
    %c0_6 = arith.constant 0 : index
    %c0_7 = arith.constant 0 : index
    %8 = vector.load %arg4[%c0_6, %c0_7] : memref<16x8xf32, #tpu.memory_space<vmem>>, vector<16x8xf32>
    %cst_8 = arith.constant dense<0.000000e+00> : vector<16x128xf32>
    %9 = tpu.matmul %8, %7, %cst_8 {dimension_numbers = #tpu.dot_dimension_numbers<[1], [0], [0], [1], [0, 0, 1, 1], [], []>} : vector<16x8xf32>, vector<8x128xf32>, vector<16x128xf32> -> vector<16x128xf32>
    %c0_9 = arith.constant 0 : index
    %c0_10 = arith.constant 0 : index
    %10 = vector.load %arg5[%c0_9, %c0_10] : memref<16x1xf32, #tpu.memory_space<vmem>>, vector<16x1xf32>
    %11 = vector.broadcast %10 : vector<16x1xf32> to vector<16x128xf32>
    %12 = arith.addf %9, %11 : vector<16x128xf32>
    %cst_11 = arith.constant 0.000000e+00 : f32
    %13 = vector.broadcast %cst_11 : f32 to vector<16x128xf32>
    %14 = arith.maximumf %12, %13 : vector<16x128xf32>
    %c0_12 = arith.constant 0 : index
    %c0_13 = arith.constant 0 : index
    %15 = vector.load %arg6[%c0_12, %c0_13] : memref<8x16xf32, #tpu.memory_space<vmem>>, vector<8x16xf32>
    %cst_14 = arith.constant dense<0.000000e+00> : vector<8x128xf32>
    %16 = tpu.matmul %15, %14, %cst_14 {dimension_numbers = #tpu.dot_dimension_numbers<[1], [0], [0], [1], [0, 0, 1, 1], [], []>} : vector<8x16xf32>, vector<16x128xf32>, vector<8x128xf32> -> vector<8x128xf32>
    %c0_15 = arith.constant 0 : index
    %c0_16 = arith.constant 0 : index
    %17 = vector.load %arg7[%c0_15, %c0_16] : memref<8x1xf32, #tpu.memory_space<vmem>>, vector<8x1xf32>
    %18 = vector.broadcast %17 : vector<8x1xf32> to vector<8x128xf32>
    %19 = arith.addf %16, %18 : vector<8x128xf32>
    %cst_17 = arith.constant 0.000000e+00 : f32
    %20 = vector.broadcast %cst_17 : f32 to vector<8x128xf32>
    %21 = arith.maximumf %19, %20 : vector<8x128xf32>
    %c0_18 = arith.constant 0 : index
    %c0_19 = arith.constant 0 : index
    %22 = vector.load %arg8[%c0_18, %c0_19] : memref<2x8xf32, #tpu.memory_space<vmem>>, vector<2x8xf32>
    %cst_20 = arith.constant dense<0.000000e+00> : vector<2x128xf32>
    %23 = tpu.matmul %22, %21, %cst_20 {dimension_numbers = #tpu.dot_dimension_numbers<[1], [0], [0], [1], [0, 0, 1, 1], [], []>} : vector<2x8xf32>, vector<8x128xf32>, vector<2x128xf32> -> vector<2x128xf32>
    %c0_21 = arith.constant 0 : index
    %c0_22 = arith.constant 0 : index
    %24 = vector.load %arg9[%c0_21, %c0_22] : memref<2x1xf32, #tpu.memory_space<vmem>>, vector<2x1xf32>
    %25 = vector.broadcast %24 : vector<2x1xf32> to vector<2x128xf32>
    %26 = arith.addf %23, %25 : vector<2x128xf32>
    %c0_23 = arith.constant 0 : index
    %c0_24 = arith.constant 0 : index
    %27 = vector.load %arg10[%c0_23, %c0_24] : memref<2x128xf32, #tpu.memory_space<vmem>>, vector<2x128xf32>
    tpu.vector_store %arg10[%c0_23, %c0_24], %26 {strides = array<i32>} : memref<2x128xf32, #tpu.memory_space<vmem>>, vector<2x128xf32>,
    return
  }
  func.func @transform_0(%arg0: i32) -> (i32, i32) {
    %c0_i32 = arith.constant 0 : i32
    %c0_i32_0 = arith.constant 0 : i32
    return %c0_i32, %arg0 : i32, i32
  }
  func.func @transform_1(%arg0: i32) -> (i32, i32) {
    %c0_i32 = arith.constant 0 : i32
    %c0_i32_0 = arith.constant 0 : i32
    %c0_i32_1 = arith.constant 0 : i32
    return %c0_i32, %c0_i32_0 : i32, i32
  }
  func.func @transform_2(%arg0: i32) -> (i32, i32) {
    %c0_i32 = arith.constant 0 : i32
    %c0_i32_0 = arith.constant 0 : i32
    %c0_i32_1 = arith.constant 0 : i32
    return %c0_i32, %c0_i32_0 : i32, i32
  }
  func.func @transform_3(%arg0: i32) -> (i32, i32) {
    %c0_i32 = arith.constant 0 : i32
    %c0_i32_0 = arith.constant 0 : i32
    %c0_i32_1 = arith.constant 0 : i32
    return %c0_i32, %c0_i32_0 : i32, i32
  }
  func.func @transform_4(%arg0: i32) -> (i32, i32) {
    %c0_i32 = arith.constant 0 : i32
    %c0_i32_0 = arith.constant 0 : i32
    %c0_i32_1 = arith.constant 0 : i32
    return %c0_i32, %c0_i32_0 : i32, i32
  }
  func.func @transform_5(%arg0: i32) -> (i32, i32) {
    %c0_i32 = arith.constant 0 : i32
    %c0_i32_0 = arith.constant 0 : i32
    %c0_i32_1 = arith.constant 0 : i32
    return %c0_i32, %c0_i32_0 : i32, i32
  }
  func.func @transform_6(%arg0: i32) -> (i32, i32) {
    %c0_i32 = arith.constant 0 : i32
    %c0_i32_0 = arith.constant 0 : i32
    %c0_i32_1 = arith.constant 0 : i32
    return %c0_i32, %c0_i32_0 : i32, i32
  }
  func.func @transform_7(%arg0: i32) -> (i32, i32) {
    %c0_i32 = arith.constant 0 : i32
    %c0_i32_0 = arith.constant 0 : i32
    %c0_i32_1 = arith.constant 0 : i32
    return %c0_i32, %c0_i32_0 : i32, i32
  }
  func.func @transform_8(%arg0: i32) -> (i32, i32) {
    %c0_i32 = arith.constant 0 : i32
    %c0_i32_0 = arith.constant 0 : i32
    %c0_i32_1 = arith.constant 0 : i32
    return %c0_i32, %c0_i32_0 : i32, i32
  }
  func.func @transform_9(%arg0: i32) -> (i32, i32) {
    %c0_i32 = arith.constant 0 : i32
    %c0_i32_0 = arith.constant 0 : i32
    return %c0_i32, %arg0 : i32, i32
  }
}

</mosaic_0001>

<bundles_post_ra>
// kernel: tpu_custom_call.1
= control target key start
LH: loop header
LB: loop body
LE: loop exit
PB: predicated region body
PF: predicated region fallthrough
CT: control target
= control target key end

     0   :  { %vm46_vm0 = vcmask 1041408   ;;  %v465_v1 = vmov 0.0   ;;  %vm466_vm1 = vmmov 0   ;;  %vm42_vm2 = vcmask 80896   ;;  %s564_s0 = inlined_call_operand.vmem [shape: f32[10,128], index: 0, kind: input, shape index: {}]   ;;  %s565_s1 = inlined_call_operand.vmem [shape: f32[8,10], index: 1, kind: input, shape index: {}]   ;;  %s566_s2 = inlined_call_operand.vmem [shape: f32[8,1], index: 2, kind: input, shape index: {}]   ;;  %s567_s3 = inlined_call_operand.vmem [shape: f32[16,8], index: 3, kind: input, shape index: {}]   ;;  %s568_s4 = inlined_call_operand.vmem [shape: f32[16,1], index: 4, kind: input, shape index: {}]   ;;  %s569_s5 = inlined_call_operand.vmem [shape: f32[8,16], index: 5, kind: input, shape index: {}]   ;;  %s570_s6 = inlined_call_operand.vmem [shape: f32[8,1], index: 6, kind: input, shape index: {}]   ;;  %s571_s7 = inlined_call_operand.vmem [shape: f32[2,8], index: 7, kind: input, shape index: {}]   ;;  %s572_s8 = inlined_call_operand.vmem [shape: f32[2,1], index: 8, kind: input, shape index: {}]   ;;  %s573_s9 = inlined_call_operand.hbm [shape: f32[2,128], index: 9, kind: output, shape index: {}]  }
   0x1   :  { %v34_v0 = vld [vmem:[%s564_s0 + $0x8] sm:$0x3]  ;;  %413 = vmatprep.subr.mxu0 %v465_v1  ;;  %v33_v2 = vld [vmem:[%s564_s0] sm:$0xff]  ;;  %417 = vmatprep.mubr.msk.f32.mxu0 %vm466_vm1, %v465_v1  ;;  %v467_v5 = vmov 0  }
   0x2   :  { %v36_v3 = vld [vmem:[%s566_s2] sm:$0xff]  ;;  %414 = vmatpush3.msk.msra.mxu0 %vm46_vm0, %v34_v0  ;;  %441 = vset.pattern.permute.xlu0 %v467_v5 }
   0x3   :  { %v35_v4 = vld [vmem:[%s565_s1] sm:$0xff] }
   0x4   :  { %14 = vsyncpa [#allocation3], 0  ;;  %415 = vmatprep.subr.mxu0 %v465_v1  ;;  %39 = vperm.xlu0 %441, %v36_v3   ;;  %v124_v6 = vld [vmem:[%s568_s4 + $0x8] sm:$0xff]  ;;  %v302_v7 = vld [vmem:[%s572_s8] sm:$0x3]  ;;  %vm135_vm3 = vcmask 64512  }
   0x5   :  { %416 = vmatpush3.msra.mxu0 %v33_v2  ;;  %442 = vset.pattern.permute.xlu1 %v467_v5  ;;  %v121_v8 = vld [vmem:[%s567_s3] sm:$0xff]  ;;  %v122_v16 = vld [vmem:[%s567_s3 + $0x8] sm:$0xff]  ;;  %vm226_vm4 = vcmask 130048   ;;  %s468_s26 = smov [#allocation2]  }
   0x6   :  { %418 = vmatmul.mubr.msk.f32.vlgmr.msra.gmra.mxu0 %vm42_vm2, %v35_v4  ;;  %432 = vmatprep.subr.mxu0 %v465_v1  ;;  %v123_v9 = vld [vmem:[%s568_s4] sm:$0xff]  ;;  %s388_s27 = sshll.u32 %s468_s26, 4  ;;  %s389_s27 = int_to_ptr.vmem [resolvable:$true] %s388_s27 }
   0x7   :  { %434 = vmatprep.mubr.msk.f32.mxu0 %vm466_vm1, %v465_v1  ;;  %422 = vmatprep.mubr.msk.f32.mxu1 %vm135_vm3, %v121_v8  ;;  %v220_v10 = vld [vmem:[%s570_s6] sm:$0xff]  ;;  %p448_p1 = scmp.lt.s32.totalorder %s389_s27, %s389_s27 }
   0x8   :  { %132 = vperm.xlu0 %441, %v124_v6   ;;  %127 = vperm.xlu1 %442, %v123_v9   ;;  %v219_v25 = vld [vmem:[%s569_s5] sm:$0xff]  ;;  %s443_s5 = scalar_lea.vmem %s389_s27, 32 }
   0x9   :  { %v301_v31 = vld [vmem:[%s571_s7] sm:$0x3]  ;;  %p444_p0 = scmp.ne.s32.totalorder %s389_s27, %s443_s5  ;;  %p449_p2 = scmp.lt.s32.totalorder %s443_s5, %s443_s5 }
   0xb   :  { %p450_p3 = por %p449_p2, %p448_p1 }
   0xc   :  { %305 = vperm.xlu0 %441, %v302_v7   ;;  %223 = vperm.xlu1 %442, %v220_v10  }
   0xd   :  { %p451_p4 = pnand %p450_p3, %p444_p0 }
  0x7f   :  { %v40_v11 = vpop.permute.xlu0 %39 }
  0x83   :  { %v133_v17 = vpop.permute.xlu0 %132  ;;  %v128_v20 = vpop.permute.xlu1 %127 }
  0x87   :  { %v224_v26 = vpop.permute.xlu1 %223  ;;  %v306_v32 = vpop.permute.xlu0 %305 }
  0xc6   :  { %v116_v12 = vpop.f32.mrf.mxu0 }
  0xc7   :  { %v117_v13 = vadd.f32 %v116_v12, %v40_v11 }
  0xc8   :  { %v419_v14 = vpop.f32.mrf.mxu0 }
  0xc9   :  { %v120_v15 = vmax.f32 %v117_v13, 0.0 }
  0xcb   :  { %420 = vmatprep.subr.mxu1 %v120_v15 }
  0xcc   :  { %421 = vmatpush3.msra.mxu1 %v120_v15 }
  0xcd   :  { %423 = vmatmul.mubr.msk.f32.vlgmr.msra.gmra.mxu1 %vm135_vm3, %v122_v16  ;;  %425 = vmatprep.subr.mxu1 %v465_v1 }
  0xce   :  { %429 = vmatprep.mubr.msk.f32.mxu1 %vm466_vm1, %v465_v1 }
 0x18d   :  { %v424_v18 = vpop.f32.mrf.mxu1 }
 0x18e   :  { %v214_v19 = vadd.f32 %v424_v18, %v133_v17 }
 0x18f   :  { %v208_v21 = vpop.f32.mrf.mxu1 }
 0x190   :  { %v218_v22 = vmax.f32 %v214_v19, 0.0  ;;  %v209_v23 = vadd.f32 %v208_v21, %v128_v20 }
 0x192   :  { %v217_v24 = vmax.f32 %v209_v23, 0.0  ;;  %426 = vmatpush3.msra.mxu1 %v218_v22 }
 0x193   :  { %427 = vmatprep.subr.mxu1 %v465_v1 }
 0x194   :  { %428 = vmatpush3.msra.mxu1 %v217_v24 }
 0x195   :  { %430 = vmatmul.mubr.msk.f32.vlgmr.msra.gmra.mxu1 %vm226_vm4, %v219_v25 }
 0x255   :  { %v296_v27 = vpop.f32.mrf.mxu1 }
 0x256   :  { %v297_v28 = vadd.f32 %v296_v27, %v224_v26 }
 0x257   :  { %v431_v29 = vpop.f32.mrf.mxu1 }
 0x258   :  { %v300_v30 = vmax.f32 %v297_v28, 0.0 }
 0x25a   :  { %433 = vmatpush3.msra.mxu0 %v300_v30 }
 0x25b   :  { %435 = vmatmul.mubr.msk.f32.vlgmr.msra.gmra.mxu0 %vm135_vm3, %v301_v31 }
 0x31b   :  { %v377_v33 = vpop.f32.mrf.mxu0 }
 0x31c   :  { %v378_v34 = vadd.f32 %v377_v33, %v306_v32 }
 0x31d   :  { %v436_v35 = vpop.f32.mrf.mxu0 }
 0x31e   :  { %381 = vst [vmem:[#allocation2] sm:$0x3] %v378_v34 }
 0x31f   :  { %454 = shalt.err (!%p451_p4)
}
 0x320   :  { %391 = dma.vmem_to_hbm [thread:$0]  %s389_s27, 32, %s573_s9, [#allocation3]  }
 0x321   :  { %463 = dma.done.wait [#allocation3], 32  }
 0x322   :  { %464 = vsyncadd [#allocation3], 4294967264 }
 0x323   :  { %395 = vsyncpa [#allocation3], 1 }

</bundles_post_ra>
